<compile_context>
chip_gen: v7x
topology: tpu7x:2x2x1
jax: 0.10.0
libtpu: 0.0.40
codegen_flags: <defaults>
</compile_context>

<pallas_src>
import jax
import jax.numpy as jnp
from jax.experimental import pallas as pl
from jax.experimental.pallas import tpu as pltpu

_TARGET_ROW_TILE = 256     # sublanes per tile (multiple of 8/16/32 dtype packs)
_TARGET_LANE_TILE = 2048   # lanes per tile (multiple of 128); ~2 MiB/tile @ f32


def _copy_kernel(x_ref, o_ref):
    # Identical input/output tile windows over [0, l_out): straight copy.
    o_ref[...] = x_ref[...]


def _slice_kernel(x_ref, o_ref):
    # Fallback for tiny time axes (l_out < 128): full-extent blocks on the
    # lane axis, static in-kernel slice (correct; only used when the tensor
    # is too small for lane-aligned tiling anyway).
    l_out = o_ref.shape[-1]
    o_ref[...] = x_ref[:, :l_out]


def chomp1d(x: jax.Array, chomp_size: int) -> jax.Array:
    """Pallas equivalent of Chomp1d.forward: x[:, :, :-chomp_size]."""
    assert chomp_size > 0, "chomp_size must be positive"
    n, c, l = x.shape
    l_out = l - chomp_size
    assert l_out > 0, "chomp_size must be smaller than the sequence length"

    rows = n * c
    x2 = x.reshape(rows, l)                   # contiguous view, free
    itemsize = x.dtype.itemsize
    pack = max(8, 32 // itemsize)             # sublane pack: 8 f32 / 16 bf16 / 32 i8

    # Row tile: full extent if small, else a pack-aligned tile.
    if rows <= _TARGET_ROW_TILE:
        tr = rows
    else:
        tr = (_TARGET_ROW_TILE // pack) * pack

    # Lane tile: multiple of 128 so both in/out BlockSpecs are lane-aligned
    # and only the retained [0, l_out) region of the input is ever moved.
    if l_out >= 128:
        tl = min(_TARGET_LANE_TILE, (l_out // 128) * 128)
        kernel = _copy_kernel
        in_spec = pl.BlockSpec((tr, tl), lambda i, j: (i, j))
    else:
        tl = l_out
        kernel = _slice_kernel
        in_spec = pl.BlockSpec((tr, l), lambda i, j: (i, 0))

    grid = (pl.cdiv(rows, tr), pl.cdiv(l_out, tl))

    out2 = pl.pallas_call(
        kernel,
        out_shape=jax.ShapeDtypeStruct((rows, l_out), x.dtype),
        grid_spec=pltpu.PrefetchScalarGridSpec(
            num_scalar_prefetch=0,
            grid=grid,
            in_specs=[in_spec],
            out_specs=pl.BlockSpec((tr, tl), lambda i, j: (i, j)),
        ),
        compiler_params=pltpu.CompilerParams(
            dimension_semantics=("parallel", "parallel"),
        ),
        cost_estimate=pl.CostEstimate(
            flops=0,
            transcendentals=0,
            bytes_accessed=2 * rows * l_out * itemsize,
        ),
    )(x2)

    return out2.reshape(n, c, l_out)


if __name__ == "__main__":
    # Case 1: small shapes implied by the module (tiny time axis -> fallback path).
    key = jax.random.PRNGKey(0)
    N, C, L, CHOMP = 2, 4, 16, 2
    x = jax.random.normal(key, (N, C, L), dtype=jnp.float32)

    y = jax.block_until_ready(chomp1d(x, CHOMP))
    y_ref = x[:, :, :-CHOMP]
    assert y.shape == (N, C, L - CHOMP), y.shape
    assert y.dtype == x.dtype
    assert jnp.array_equal(y, y_ref), "Pallas Chomp1d mismatch vs reference (small)"

    # Case 2: exercises the lane-tiled matched-BlockSpec copy path
    # (l_out >= 128, partial edge tile on the time axis).
    key2 = jax.random.PRNGKey(0)
    N2, C2, L2, CHOMP2 = 2, 8, 256, 3
    x2 = jax.random.normal(key2, (N2, C2, L2), dtype=jnp.float32)

    y2 = jax.block_until_ready(chomp1d(x2, CHOMP2))
    assert y2.shape == (N2, C2, L2 - CHOMP2), y2.shape
    assert jnp.array_equal(y2, x2[:, :, :-CHOMP2]), "Pallas Chomp1d mismatch (tiled)"

    print("KERNEL_OK")
</pallas_src>

<mosaic_0001>
module attributes {stable_mosaic.version = 11 : i64} {
  func.func @_slice_kernel(%arg0: i32, %arg1: i32, %arg2: memref<8x16xf32, #tpu.memory_space<vmem>>, %arg3: memref<8x14xf32, #tpu.memory_space<vmem>>) attributes {dimension_semantics = [#tpu.dimension_semantics<parallel>, #tpu.dimension_semantics<parallel>], iteration_bounds = array<i64: 1, 1>, scalar_prefetch = 0 : i64, scratch_operands = 0 : i64, tpu.core_type = #tpu.core_type<tc>, window_params = [{transform_indices = @transform_0, window_bounds = array<i64: 8, 16>}, {transform_indices = @transform_1, window_bounds = array<i64: 8, 14>}]} {
    %c0 = arith.constant 0 : index
    %c0_0 = arith.constant 0 : index
    %0 = vector.load %arg2[%c0, %c0_0] : memref<8x16xf32, #tpu.memory_space<vmem>>, vector<8x14xf32>
    %c0_1 = arith.constant 0 : index
    %c0_2 = arith.constant 0 : index
    %1 = vector.load %arg3[%c0_1, %c0_2] : memref<8x14xf32, #tpu.memory_space<vmem>>, vector<8x14xf32>
    tpu.vector_store %arg3[%c0_1, %c0_2], %0 {strides = array<i32>} : memref<8x14xf32, #tpu.memory_space<vmem>>, vector<8x14xf32>,
    return
  }
  func.func @transform_0(%arg0: i32, %arg1: i32) -> (i32, i32) {
    %c0_i32 = arith.constant 0 : i32
    %c0_i32_0 = arith.constant 0 : i32
    return %arg0, %c0_i32 : i32, i32
  }
  func.func @transform_1(%arg0: i32, %arg1: i32) -> (i32, i32) {
    %c0_i32 = arith.constant 0 : i32
    return %arg0, %arg1 : i32, i32
  }
}

</mosaic_0001>

<bundles_post_ra>
// kernel: tpu_custom_call.1
= control target key start
LH: loop header
LB: loop body
LE: loop exit
PB: predicated region body
PF: predicated region fallthrough
CT: control target
= control target key end

     0   :  { %6 = vsyncpa [#allocation3], 0  ;;  %s125_s0 = inlined_call_operand.hbm [shape: f32[8,16], index: 0, kind: input, shape index: {}]   ;;  %s126_s1 = inlined_call_operand.hbm [shape: f32[8,14], index: 1, kind: output, shape index: {}]  }
   0x1   :  { %7 = vsyncpa [#allocation4], 0  ;;  %s89_s6 = smov [#allocation2]   ;;  %s41_s10 = scalar_lea.hbm %s125_s0, 128 }
   0x2   :  { %s14_s7 = sshll.u32 %s89_s6, 4  ;;  %p42_p0 = scmp.ne.s32.totalorder %s125_s0, %s41_s10  ;;  %s15_s7 = int_to_ptr.vmem [resolvable:$true] %s14_s7 }
   0x3   :  { %p45_p1 = scmp.lt.u32.totalorder %s41_s10, %s125_s0 }
   0x5   :  { %p47_p2 = pnand %p45_p1, %p42_p0 }
   0x7   :  { %50 = shalt.err (!%p47_p2)
}
   0x8   :  { %s51_s15 = scalar_lea.vmem %s15_s7, 128  ;;  %p56_p4 = scmp.lt.s32.totalorder %s15_s7, %s15_s7 }
   0x9   :  { %p52_p3 = scmp.ne.s32.totalorder %s15_s7, %s51_s15  ;;  %p57_p5 = scmp.lt.s32.totalorder %s51_s15, %s51_s15 }
   0xb   :  { %p58_p6 = por %p57_p5, %p56_p4 }
   0xd   :  { %p59_p7 = pnand %p58_p6, %p52_p3 }
   0xf   :  { %62 = shalt.err (!%p59_p7)
}
  0x10   :  { %17 = dma.hbm_to_vmem [thread:$0]  %s125_s0, 128, %s15_s7, [#allocation3]  }
  0x11   :  { %85 = dma.done.wait [#allocation3], 128  }
  0x12   :  { %86 = vsyncadd [#allocation3], 4294967168  ;;  %s90_s18 = smov [#allocation5]   ;;  %vm22_vm0 = vcmask 113664   ;;  %v21_v0 = vld [vmem:[#allocation2] sm:$0xff] }
  0x13   :  { %s30_s19 = sshll.u32 %s90_s18, 4  ;;  %23 = vst.msk [vmem:[#allocation5] sm:$0xff] %vm22_vm0, %v21_v0  ;;  %s31_s19 = int_to_ptr.vmem [resolvable:$true] %s30_s19 }
  0x14   :  { %s63_s20 = scalar_lea.vmem %s31_s19, 128  ;;  %p68_p9 = scmp.lt.s32.totalorder %s31_s19, %s31_s19 }
  0x15   :  { %p64_p8 = scmp.ne.s32.totalorder %s31_s19, %s63_s20  ;;  %p69_p10 = scmp.lt.s32.totalorder %s63_s20, %s63_s20 }
  0x17   :  { %p70_p11 = por %p69_p10, %p68_p9 }
  0x19   :  { %p71_p12 = pnand %p70_p11, %p64_p8 }
  0x1b   :  { %74 = shalt.err (!%p71_p12)
}
  0x1c   :  { %s75_s23 = scalar_lea.hbm %s126_s1, 128 }
  0x1d   :  { %p76_p13 = scmp.ne.s32.totalorder %s126_s1, %s75_s23  ;;  %p79_p0 = scmp.lt.u32.totalorder %s75_s23, %s126_s1 }
  0x1f   :  { %p81_p1 = pnand %p79_p0, %p76_p13 }
  0x21   :  { %84 = shalt.err (!%p81_p1)
}
  0x22   :  { %33 = dma.vmem_to_hbm [thread:$0]  %s31_s19, 128, %s126_s1, [#allocation4]  }
  0x23   :  { %87 = dma.done.wait [#allocation4], 128  }
  0x24   :  { %88 = vsyncadd [#allocation4], 4294967168 }
  0x25   :  { %37 = vsyncpa [#allocation3], 1 }
  0x26   :  { %38 = vsyncpa [#allocation4], 1 }

</bundles_post_ra>
